<compile_context>
chip_gen: v6e
topology: v6e:2x2x1
jax: 0.10.0
libtpu: 0.0.40
codegen_flags: <defaults>
</compile_context>

<pallas_src>
import functools

import jax
import jax.numpy as jnp
from jax.experimental import pallas as pl
from jax.experimental.pallas import tpu as pltpu


def _round_up(n, m):
    return ((n + m - 1) // m) * m


def _fused_mlp_kernel(*refs):
    """refs = (x_ref, w0_ref, b0_ref, w1_ref, b1_ref, ..., o_ref).

    Processes one batch tile. Every layer applies ReLU to its input (f32, VPU),
    then a bf16 x bf16 -> f32 MXU matmul plus an f32 bias add. The Python loop
    is unrolled at trace time; intermediates never leave vregs/VMEM.
    """
    x_ref = refs[0]
    o_ref = refs[-1]
    param_refs = refs[1:-1]

    x = x_ref[...]                                    # f32 activations
    for i in range(0, len(param_refs), 2):
        w = param_refs[i][...]                        # bf16 weight, VMEM-resident
        b = param_refs[i + 1][...]                    # f32 bias row (1, D)
        x = jnp.maximum(x, 0.0)                       # ReLU on layer input (f32)
        x = jnp.dot(x.astype(w.dtype), w,
                    preferred_element_type=jnp.float32) + b
    o_ref[...] = x.astype(o_ref.dtype)


def init_linear_params(key, in_features, out_features):
    """Mimic LinearNet.initialize_weights for nn.Linear:
    - weight: xavier_uniform_ with gain = calculate_gain('relu') = sqrt(2)
    - bias:   uniform_(0, 1)
    Weight kept transposed as (in_features, out_features) for x @ W.
    """
    kw, kb = jax.random.split(key)
    gain = 2.0 ** 0.5
    bound = gain * (6.0 / (in_features + out_features)) ** 0.5
    w = jax.random.uniform(
        kw, (in_features, out_features), jnp.float32, minval=-bound, maxval=bound
    )
    b = jax.random.uniform(kb, (1, out_features), jnp.float32, minval=0.0, maxval=1.0)
    return w, b


def build_linear_net_params(key, input_size, output_size, hidden_layers):
    params = []
    in_f = input_size
    for size in hidden_layers:
        key, sub = jax.random.split(key)
        params.append(init_linear_params(sub, in_f, size))
        in_f = size
    key, sub = jax.random.split(key)
    params.append(init_linear_params(sub, in_f, output_size))
    return tuple(params)


def prepare_padded_params(params, weight_dtype=jnp.bfloat16):
    """One-time layout prep: pad every weight/bias to lane-aligned (multiples of
    128) shapes and cast weights to bf16. Zero padding is mathematically inert
    for the relu/linear chain. Skips the copy when dims are already aligned.
    Returns a flat tuple (w0, b0, w1, b1, ...)."""
    flat = []
    for w, b in params:
        din, dout = w.shape
        din_p = _round_up(max(din, 128), 128)
        dout_p = _round_up(max(dout, 128), 128)
        if din == din_p and dout == dout_p:
            wp = w
        else:
            wp = jnp.zeros((din_p, dout_p), w.dtype).at[:din, :dout].set(w)
        if dout == dout_p:
            bp = b
        else:
            bp = jnp.zeros((1, dout_p), b.dtype).at[:, :dout].set(b)
        flat += [wp.astype(weight_dtype), bp.astype(jnp.float32)]
    return tuple(flat)


@functools.partial(jax.jit, static_argnames=("out_features",))
def fused_linear_net(x, padded_params, out_features):
    """Whole LinearNet forward in one pallas_call, gridded over batch tiles.

    x: (B, Din) f32. padded_params: flat tuple (w0, b0, ...) from
    prepare_padded_params (bf16 weights, f32 biases, lane-aligned shapes).
    """
    B, Din = x.shape
    Din_p = padded_params[0].shape[0]
    Dout_p = padded_params[-1].shape[1]

    # Batch tile: small batches -> one sublane-aligned tile; big batches -> 256
    # rows per grid step (keeps the live activation bounded for v7x VMEM and
    # lets the parallel grid axis shard across TensorCores).
    TILE_B = min(256, _round_up(max(B, 8), 8))
    Bp = _round_up(max(B, TILE_B), TILE_B)

    if Bp == B and Din_p == Din:
        xp = x
    else:
        xp = jnp.zeros((Bp, Din_p), x.dtype).at[:B, :Din].set(x)

    grid = (Bp // TILE_B,)

    # x / out tiles advance with the grid; weights & biases use constant
    # index_maps so they stay resident in VMEM (no re-DMA per step).
    in_specs = [pl.BlockSpec((TILE_B, Din_p), lambda i: (i, 0))]
    for p in padded_params:
        in_specs.append(pl.BlockSpec(p.shape, lambda i: (0, 0)))
    out_spec = pl.BlockSpec((TILE_B, Dout_p), lambda i: (i, 0))

    # Cost hint for XLA's scheduler.
    flops = 0
    param_bytes = 0
    for idx in range(0, len(padded_params), 2):
        w = padded_params[idx]
        b = padded_params[idx + 1]
        flops += 2 * Bp * w.shape[0] * w.shape[1]
        param_bytes += w.size * w.dtype.itemsize + b.size * b.dtype.itemsize
    bytes_accessed = (
        param_bytes
        + Bp * Din_p * x.dtype.itemsize
        + Bp * Dout_p * x.dtype.itemsize
    )

    # VMEM budget: resident params (+headroom for layouts) + double-buffered
    # activation in/out tiles + live intermediates. Clamped to v7x's 64 MiB.
    # TODO(synk): for layer widths where resident params exceed ~half of VMEM,
    # a K/N-tiled fallback (grid over the reduction axis + f32 acc scratch)
    # would be needed; not required for this model's sizes.
    act_bytes = 2 * (TILE_B * Din_p + TILE_B * Dout_p) * 4
    max_width = max(p.shape[-1] for p in padded_params)
    live_bytes = 2 * TILE_B * max_width * 4
    vmem_limit = int(
        min(64 * 1024 * 1024,
            max(8 * 1024 * 1024, 2 * param_bytes + act_bytes + live_bytes + (2 << 20)))
    )

    out_p = pl.pallas_call(
        _fused_mlp_kernel,
        out_shape=jax.ShapeDtypeStruct((Bp, Dout_p), x.dtype),
        grid=grid,
        in_specs=in_specs,
        out_specs=out_spec,
        compiler_params=pltpu.CompilerParams(
            dimension_semantics=("parallel",),
            vmem_limit_bytes=vmem_limit,
        ),
        cost_estimate=pl.CostEstimate(
            flops=int(flops), transcendentals=0, bytes_accessed=int(bytes_accessed)
        ),
    )(xp, *padded_params)

    return out_p[:B, :out_features]


if __name__ == "__main__":
    # TODO(synk): optimizer / MSE loss / save() / model_info() are training &
    # serialization utilities with no Pallas forward-pass equivalent; only
    # forward() is implemented.
    key = jax.random.PRNGKey(0)

    # Small deterministic config consistent with the module:
    # LinearNet(input_size=32, output_size=8, hidden_layers=[64, 96]), batch=4.
    input_size = 32
    output_size = 8
    hidden_layers = [64, 96]
    batch = 4

    key, pkey, xkey = jax.random.split(key, 3)
    params = build_linear_net_params(pkey, input_size, output_size, hidden_layers)
    # One-time layout prep (pad + bf16 cast) -- NOT repeated per forward call.
    padded_params = prepare_padded_params(params)
    x = jax.random.normal(xkey, (batch, input_size), jnp.float32)

    out = fused_linear_net(x, padded_params, output_size)
    out = jax.block_until_ready(out)

    # Reference with identical bf16-matmul / f32-accumulate numerics.
    ref_bf16 = x
    for w, b in params:
        ref_bf16 = jnp.dot(
            jnp.maximum(ref_bf16, 0.0).astype(jnp.bfloat16),
            w.astype(jnp.bfloat16),
            preferred_element_type=jnp.float32,
        ) + b
    # Full-f32 reference (loose tolerance: bf16 weight quantization).
    ref_f32 = x
    for w, b in params:
        ref_f32 = jnp.maximum(ref_f32, 0.0) @ w + b

    assert out.shape == (batch, output_size)
    assert jnp.allclose(out, ref_bf16, atol=1e-4, rtol=1e-4)
    assert jnp.allclose(out, ref_f32, atol=1e-1, rtol=1e-1)

    print("KERNEL_OK")
</pallas_src>

<mosaic_0001>
module attributes {stable_mosaic.version = 11 : i64} {
  func.func @_fused_mlp_kernel(%arg0: i32, %arg1: memref<8x128xf32, #tpu.memory_space<vmem>>, %arg2: memref<128x128xbf16, #tpu.memory_space<vmem>>, %arg3: memref<1x128xf32, #tpu.memory_space<vmem>>, %arg4: memref<128x128xbf16, #tpu.memory_space<vmem>>, %arg5: memref<1x128xf32, #tpu.memory_space<vmem>>, %arg6: memref<128x128xbf16, #tpu.memory_space<vmem>>, %arg7: memref<1x128xf32, #tpu.memory_space<vmem>>, %arg8: memref<8x128xf32, #tpu.memory_space<vmem>>) attributes {dimension_semantics = [#tpu.dimension_semantics<parallel>], iteration_bounds = array<i64: 1>, scalar_prefetch = 0 : i64, scratch_operands = 0 : i64, tpu.core_type = #tpu.core_type<tc>, window_params = [{transform_indices = @transform_0, window_bounds = array<i64: 8, 128>}, {pipeline_mode = #tpu.pipeline_mode<synchronous>, transform_indices = @transform_1, window_bounds = array<i64: 128, 128>}, {pipeline_mode = #tpu.pipeline_mode<synchronous>, transform_indices = @transform_2, window_bounds = array<i64: 1, 128>}, {pipeline_mode = #tpu.pipeline_mode<synchronous>, transform_indices = @transform_3, window_bounds = array<i64: 128, 128>}, {pipeline_mode = #tpu.pipeline_mode<synchronous>, transform_indices = @transform_4, window_bounds = array<i64: 1, 128>}, {pipeline_mode = #tpu.pipeline_mode<synchronous>, transform_indices = @transform_5, window_bounds = array<i64: 128, 128>}, {pipeline_mode = #tpu.pipeline_mode<synchronous>, transform_indices = @transform_6, window_bounds = array<i64: 1, 128>}, {transform_indices = @transform_7, window_bounds = array<i64: 8, 128>}]} {
    %c0 = arith.constant 0 : index
    %c0_0 = arith.constant 0 : index
    %0 = vector.load %arg1[%c0, %c0_0] : memref<8x128xf32, #tpu.memory_space<vmem>>, vector<8x128xf32>
    %c0_1 = arith.constant 0 : index
    %c0_2 = arith.constant 0 : index
    %1 = vector.load %arg2[%c0_1, %c0_2] : memref<128x128xbf16, #tpu.memory_space<vmem>>, vector<128x128xbf16>
    %c0_3 = arith.constant 0 : index
    %c0_4 = arith.constant 0 : index
    %2 = vector.load %arg3[%c0_3, %c0_4] : memref<1x128xf32, #tpu.memory_space<vmem>>, vector<1x128xf32>
    %cst = arith.constant 0.000000e+00 : f32
    %3 = vector.broadcast %cst : f32 to vector<8x128xf32>
    %4 = arith.maximumf %0, %3 : vector<8x128xf32>
    %5 = arith.truncf %4 : vector<8x128xf32> to vector<8x128xbf16>
    %cst_5 = arith.constant dense<0.000000e+00> : vector<8x128xf32>
    %6 = tpu.matmul %5, %1, %cst_5 {dimension_numbers = #tpu.dot_dimension_numbers<[1], [0], [0], [1], [0, 0, 1, 1], [], []>} : vector<8x128xbf16>, vector<128x128xbf16>, vector<8x128xf32> -> vector<8x128xf32>
    %7 = vector.broadcast %2 : vector<1x128xf32> to vector<8x128xf32>
    %8 = arith.addf %6, %7 : vector<8x128xf32>
    %c0_6 = arith.constant 0 : index
    %c0_7 = arith.constant 0 : index
    %9 = vector.load %arg4[%c0_6, %c0_7] : memref<128x128xbf16, #tpu.memory_space<vmem>>, vector<128x128xbf16>
    %c0_8 = arith.constant 0 : index
    %c0_9 = arith.constant 0 : index
    %10 = vector.load %arg5[%c0_8, %c0_9] : memref<1x128xf32, #tpu.memory_space<vmem>>, vector<1x128xf32>
    %cst_10 = arith.constant 0.000000e+00 : f32
    %11 = vector.broadcast %cst_10 : f32 to vector<8x128xf32>
    %12 = arith.maximumf %8, %11 : vector<8x128xf32>
    %13 = arith.truncf %12 : vector<8x128xf32> to vector<8x128xbf16>
    %cst_11 = arith.constant dense<0.000000e+00> : vector<8x128xf32>
    %14 = tpu.matmul %13, %9, %cst_11 {dimension_numbers = #tpu.dot_dimension_numbers<[1], [0], [0], [1], [0, 0, 1, 1], [], []>} : vector<8x128xbf16>, vector<128x128xbf16>, vector<8x128xf32> -> vector<8x128xf32>
    %15 = vector.broadcast %10 : vector<1x128xf32> to vector<8x128xf32>
    %16 = arith.addf %14, %15 : vector<8x128xf32>
    %c0_12 = arith.constant 0 : index
    %c0_13 = arith.constant 0 : index
    %17 = vector.load %arg6[%c0_12, %c0_13] : memref<128x128xbf16, #tpu.memory_space<vmem>>, vector<128x128xbf16>
    %c0_14 = arith.constant 0 : index
    %c0_15 = arith.constant 0 : index
    %18 = vector.load %arg7[%c0_14, %c0_15] : memref<1x128xf32, #tpu.memory_space<vmem>>, vector<1x128xf32>
    %cst_16 = arith.constant 0.000000e+00 : f32
    %19 = vector.broadcast %cst_16 : f32 to vector<8x128xf32>
    %20 = arith.maximumf %16, %19 : vector<8x128xf32>
    %21 = arith.truncf %20 : vector<8x128xf32> to vector<8x128xbf16>
    %cst_17 = arith.constant dense<0.000000e+00> : vector<8x128xf32>
    %22 = tpu.matmul %21, %17, %cst_17 {dimension_numbers = #tpu.dot_dimension_numbers<[1], [0], [0], [1], [0, 0, 1, 1], [], []>} : vector<8x128xbf16>, vector<128x128xbf16>, vector<8x128xf32> -> vector<8x128xf32>
    %23 = vector.broadcast %18 : vector<1x128xf32> to vector<8x128xf32>
    %24 = arith.addf %22, %23 : vector<8x128xf32>
    %c0_18 = arith.constant 0 : index
    %c0_19 = arith.constant 0 : index
    %25 = vector.load %arg8[%c0_18, %c0_19] : memref<8x128xf32, #tpu.memory_space<vmem>>, vector<8x128xf32>
    tpu.vector_store %arg8[%c0_18, %c0_19], %24 {strides = array<i32>} : memref<8x128xf32, #tpu.memory_space<vmem>>, vector<8x128xf32>,
    return
  }
  func.func @transform_0(%arg0: i32) -> (i32, i32) {
    %c0_i32 = arith.constant 0 : i32
    %c0_i32_0 = arith.constant 0 : i32
    return %arg0, %c0_i32 : i32, i32
  }
  func.func @transform_1(%arg0: i32) -> (i32, i32) {
    %c0_i32 = arith.constant 0 : i32
    %c0_i32_0 = arith.constant 0 : i32
    %c0_i32_1 = arith.constant 0 : i32
    return %c0_i32, %c0_i32_0 : i32, i32
  }
  func.func @transform_2(%arg0: i32) -> (i32, i32) {
    %c0_i32 = arith.constant 0 : i32
    %c0_i32_0 = arith.constant 0 : i32
    %c0_i32_1 = arith.constant 0 : i32
    return %c0_i32, %c0_i32_0 : i32, i32
  }
  func.func @transform_3(%arg0: i32) -> (i32, i32) {
    %c0_i32 = arith.constant 0 : i32
    %c0_i32_0 = arith.constant 0 : i32
    %c0_i32_1 = arith.constant 0 : i32
    return %c0_i32, %c0_i32_0 : i32, i32
  }
  func.func @transform_4(%arg0: i32) -> (i32, i32) {
    %c0_i32 = arith.constant 0 : i32
    %c0_i32_0 = arith.constant 0 : i32
    %c0_i32_1 = arith.constant 0 : i32
    return %c0_i32, %c0_i32_0 : i32, i32
  }
  func.func @transform_5(%arg0: i32) -> (i32, i32) {
    %c0_i32 = arith.constant 0 : i32
    %c0_i32_0 = arith.constant 0 : i32
    %c0_i32_1 = arith.constant 0 : i32
    return %c0_i32, %c0_i32_0 : i32, i32
  }
  func.func @transform_6(%arg0: i32) -> (i32, i32) {
    %c0_i32 = arith.constant 0 : i32
    %c0_i32_0 = arith.constant 0 : i32
    %c0_i32_1 = arith.constant 0 : i32
    return %c0_i32, %c0_i32_0 : i32, i32
  }
  func.func @transform_7(%arg0: i32) -> (i32, i32) {
    %c0_i32 = arith.constant 0 : i32
    %c0_i32_0 = arith.constant 0 : i32
    return %arg0, %c0_i32 : i32, i32
  }
}

</mosaic_0001>

<bundles_post_ra>
// kernel: fused_linear_net.1
= control target key start
LH: loop header
LB: loop body
LE: loop exit
PB: predicated region body
PF: predicated region fallthrough
CT: control target
= control target key end

     0   :  { %12 = vsyncpa [#allocation3], 0  ;;  %s725_s0 = inlined_call_operand.vmem [shape: f32[8,128], index: 0, kind: input, shape index: {}]   ;;  %s726_s1 = inlined_call_operand.hbm [shape: bf16[128,128], index: 1, kind: input, shape index: {}]   ;;  %s727_s2 = inlined_call_operand.vmem [shape: f32[1,128], index: 2, kind: input, shape index: {}]   ;;  %s728_s3 = inlined_call_operand.hbm [shape: bf16[128,128], index: 3, kind: input, shape index: {}]   ;;  %s729_s4 = inlined_call_operand.vmem [shape: f32[1,128], index: 4, kind: input, shape index: {}]   ;;  %s730_s5 = inlined_call_operand.hbm [shape: bf16[128,128], index: 5, kind: input, shape index: {}]   ;;  %s731_s6 = inlined_call_operand.vmem [shape: f32[1,128], index: 6, kind: input, shape index: {}]   ;;  %s732_s7 = inlined_call_operand.vmem [shape: f32[8,128], index: 7, kind: output, shape index: {}]  }
   0x1   :  { %13 = vsyncpa [#allocation5], 0  ;;  %s624_s24 = smov [#allocation4]   ;;  %s625_s26 = smov [#allocation2]  }
   0x2   :  { %s35_s25 = sshll.u32 %s624_s24, 4  ;;  %s21_s27 = sshll.u32 %s625_s26, 4  ;;  %s36_s25 = int_to_ptr.vmem [resolvable:$true] %s35_s25  ;;  %s22_s27 = int_to_ptr.vmem [resolvable:$true] %s21_s27 }
   0x3   :  { %s568_s28 = scalar_lea.vmem %s36_s25, 1024  ;;  %p573_p1 = scmp.lt.s32.totalorder %s36_s25, %s36_s25 }
   0x4   :  { %p569_p0 = scmp.ne.s32.totalorder %s36_s25, %s568_s28  ;;  %p574_p2 = scmp.lt.s32.totalorder %s568_s28, %s568_s28 }
   0x6   :  { %p575_p3 = por %p574_p2, %p573_p1 }
   0x8   :  { %p576_p4 = pnand %p575_p3, %p569_p0 }
   0xa   :  { %579 = shalt.err (!%p576_p4)
}
   0xb   :  { %s626_s29 = smov 64   ;;  %s627_s30 = smov 4  }
   0xc   :  { %41 = dma.hbm_to_vmem [thread:$0]  %s728_s3, 1024, %s36_s25, [#allocation5], %s626_s29, %s626_s29, %s627_s30  }
   0xd   :  { %s588_s10 = scalar_lea.vmem %s22_s27, 1024  ;;  %p593_p6 = scmp.lt.s32.totalorder %s22_s27, %s22_s27 }
   0xe   :  { %p589_p5 = scmp.ne.s32.totalorder %s22_s27, %s588_s10  ;;  %p594_p7 = scmp.lt.s32.totalorder %s588_s10, %s588_s10 }
  0x10   :  { %p595_p8 = por %p594_p7, %p593_p6 }
  0x12   :  { %p596_p9 = pnand %p595_p8, %p589_p5 }
  0x14   :  { %599 = shalt.err (!%p596_p9)
}
  0x15   :  { %27 = dma.hbm_to_vmem [thread:$0]  %s726_s1, 1024, %s22_s27, [#allocation3], %s626_s29, %s626_s29, %s627_s30  }
  0x16   :  { %s628_s13 = smov [#allocation6]  }
  0x17   :  { %s49_s14 = sshll.u32 %s628_s13, 4  ;;  %s50_s14 = int_to_ptr.vmem [resolvable:$true] %s49_s14 }
  0x18   :  { %s608_s15 = scalar_lea.vmem %s50_s14, 1024  ;;  %p613_p11 = scmp.lt.s32.totalorder %s50_s14, %s50_s14 }
  0x19   :  { %p609_p10 = scmp.ne.s32.totalorder %s50_s14, %s608_s15  ;;  %p614_p12 = scmp.lt.s32.totalorder %s608_s15, %s608_s15 }
  0x1b   :  { %p615_p13 = por %p614_p12, %p613_p11 }
  0x1d   :  { %p616_p0 = pnand %p615_p13, %p609_p10 }
  0x1f   :  { %619 = shalt.err (!%p616_p0)
}
  0x20   :  { %55 = dma.hbm_to_vmem [thread:$0]  %s730_s5, 1024, %s50_s14, [#allocation5], %s626_s29, %s626_s29, %s627_s30  }
  0x21   :  { %620 = dma.done.wait [#allocation3], 1024  }
  0x22   :  { %621 = vsyncadd [#allocation3], 4294966272 }
  0x23   :  { %622 = dma.done.wait [#allocation5], 2048  }
  0x24   :  { %623 = vsyncadd [#allocation5], 4294965248  ;;  %v629_v0 = vmov 0.0   ;;  %vm630_vm0 = vmmov 0   ;;  %v536_v1 = vld [vmem:[#allocation2 + $0x38] sm:$0xff]   ;;  %v537_v2 = vld [vmem:[#allocation2 + $0x30] sm:$0xff]  }
  0x25   :  { %469 = vmatprep.subr.bf16.mxu0 %v629_v0  ;;  %485 = vmatprep.mubr.msk.bf16.mxu0 %vm630_vm0, %v629_v0  ;;  %v538_v3 = vld [vmem:[#allocation2 + $0x28] sm:$0xff]   ;;  %v544_v4 = vld [vmem:[#allocation4 + $0x38] sm:$0xff]   ;;  %v539_v5 = vld [vmem:[#allocation2 + $0x20] sm:$0xff]  }
  0x26   :  { %489 = vmatprep.subr.bf16.mxu1 %v629_v0  ;;  %505 = vmatprep.mubr.msk.bf16.mxu1 %vm630_vm0, %v629_v0  ;;  %v545_v6 = vld [vmem:[#allocation4 + $0x30] sm:$0xff]   ;;  %v540_v7 = vld [vmem:[#allocation2 + $0x18] sm:$0xff]   ;;  %v546_v8 = vld [vmem:[#allocation4 + $0x28] sm:$0xff]  }
  0x27   :  { %470 = vmatpush3.bf16.msra.mxu0 %v536_v1  ;;  %490 = vmatpush3.bf16.msra.mxu1 %v544_v4  ;;  %v541_v9 = vld [vmem:[#allocation2 + $0x10] sm:$0xff]   ;;  %v547_v10 = vld [vmem:[#allocation4 + $0x20] sm:$0xff]   ;;  %v542_v11 = vld [vmem:[#allocation2 + $0x8] sm:$0xff]  }
  0x28   :  { %471 = vmatprep.subr.bf16.mxu0 %v629_v0  ;;  %491 = vmatprep.subr.bf16.mxu1 %v629_v0  ;;  %v68_v12 = vld [vmem:[%s725_s0] sm:$0xff]  ;;  %v548_v13 = vld [vmem:[#allocation4 + $0x18] sm:$0xff]   ;;  %v549_v16 = vld [vmem:[#allocation4 + $0x10] sm:$0xff]  }
  0x29   :  { %v86_v14 = vmax.f32 %v68_v12, 0.0  ;;  %v543_v15 = vld [vmem:[#allocation2] sm:$0xff]   ;;  %v550_v18 = vld [vmem:[#allocation4 + $0x8] sm:$0xff]   ;;  %v552_v20 = vld [vmem:[#allocation6 + $0x38] sm:$0xff]  }
  0x2a   :  { %v551_v19 = vld [vmem:[#allocation4] sm:$0xff]   ;;  %v553_v21 = vld [vmem:[#allocation6 + $0x30] sm:$0xff]   ;;  %v554_v22 = vld [vmem:[#allocation6 + $0x28] sm:$0xff]  }
  0x2b   :  { %472 = vmatpush3.bf16.msra.mxu0 %v537_v2  ;;  %492 = vmatpush3.bf16.msra.mxu1 %v545_v6  ;;  %v87_v17 = vpack.c.bf16 %v86_v14, %v86_v14  ;;  %v555_v23 = vld [vmem:[#allocation6 + $0x20] sm:$0xff]   ;;  %v556_v24 = vld [vmem:[#allocation6 + $0x18] sm:$0xff]   ;;  %v557_v25 = vld [vmem:[#allocation6 + $0x10] sm:$0xff]  }
  0x2c   :  { %473 = vmatprep.subr.bf16.mxu0 %v629_v0  ;;  %493 = vmatprep.subr.bf16.mxu1 %v629_v0  ;;  %v415_v26 = vld [vmem:[%s727_s2] ss:$0 sm:$0xff]  ;;  %v558_v34 = vld [vmem:[#allocation6 + $0x8] sm:$0xff]  }
  0x2d   :  { %v559_v35 = vld [vmem:[#allocation6] sm:$0xff]  }
  0x2e   :  { %v424_v36 = vld [vmem:[%s729_s4] ss:$0 sm:$0xff] }
  0x2f   :  { %474 = vmatpush3.bf16.msra.mxu0 %v538_v3  ;;  %494 = vmatpush3.bf16.msra.mxu1 %v546_v8  ;;  %v433_v44 = vld [vmem:[%s731_s6] ss:$0 sm:$0xff] }
  0x30   :  { %475 = vmatprep.subr.bf16.mxu0 %v629_v0  ;;  %495 = vmatprep.subr.bf16.mxu1 %v629_v0 }
  0x33   :  { %476 = vmatpush3.bf16.msra.mxu0 %v539_v5  ;;  %496 = vmatpush3.bf16.msra.mxu1 %v547_v10 }
  0x34   :  { %477 = vmatprep.subr.bf16.mxu0 %v629_v0  ;;  %497 = vmatprep.subr.bf16.mxu1 %v629_v0 }
  0x37   :  { %478 = vmatpush3.bf16.msra.mxu0 %v540_v7  ;;  %498 = vmatpush3.bf16.msra.mxu1 %v548_v13 }
  0x38   :  { %479 = vmatprep.subr.bf16.mxu0 %v629_v0  ;;  %499 = vmatprep.subr.bf16.mxu1 %v629_v0 }
  0x3b   :  { %480 = vmatpush3.bf16.msra.mxu0 %v541_v9  ;;  %500 = vmatpush3.bf16.msra.mxu1 %v549_v16 }
  0x3c   :  { %481 = vmatprep.subr.bf16.mxu0 %v629_v0  ;;  %501 = vmatprep.subr.bf16.mxu1 %v629_v0 }
  0x3f   :  { %482 = vmatpush3.bf16.msra.mxu0 %v542_v11  ;;  %502 = vmatpush3.bf16.msra.mxu1 %v550_v18 }
  0x40   :  { %483 = vmatprep.subr.bf16.mxu0 %v629_v0  ;;  %503 = vmatprep.subr.bf16.mxu1 %v629_v0 }
  0x43   :  { %484 = vmatpush3.bf16.msra.mxu0 %v543_v15  ;;  %504 = vmatpush3.bf16.msra.mxu1 %v551_v19 }
  0x44   :  { %509 = vmatprep.subr.bf16.mxu0 %v629_v0 }
  0x46   :  { %486 = vmatmul.mubr.bf16.vlgmr.msra.gmra.mxu0 %v87_v17 }
  0x47   :  { %525 = vmatprep.mubr.msk.bf16.mxu0 %vm630_vm0, %v629_v0  ;;  %510 = vmatpush3.bf16.msra.mxu0 %v552_v20 }
  0x48   :  { %511 = vmatprep.subr.bf16.mxu0 %v629_v0 }
  0x4b   :  { %512 = vmatpush3.bf16.msra.mxu0 %v553_v21 }
  0x4c   :  { %513 = vmatprep.subr.bf16.mxu0 %v629_v0 }
  0x4f   :  { %514 = vmatpush3.bf16.msra.mxu0 %v554_v22 }
  0x50   :  { %515 = vmatprep.subr.bf16.mxu0 %v629_v0 }
  0x53   :  { %516 = vmatpush3.bf16.msra.mxu0 %v555_v23 }
  0x54   :  { %517 = vmatprep.subr.bf16.mxu0 %v629_v0 }
  0x57   :  { %518 = vmatpush3.bf16.msra.mxu0 %v556_v24 }
  0x58   :  { %519 = vmatprep.subr.bf16.mxu0 %v629_v0 }
  0x5b   :  { %520 = vmatpush3.bf16.msra.mxu0 %v557_v25 }
  0x5c   :  { %521 = vmatprep.subr.bf16.mxu0 %v629_v0 }
  0x5f   :  { %522 = vmatpush3.bf16.msra.mxu0 %v558_v34 }
  0x60   :  { %523 = vmatprep.subr.bf16.mxu0 %v629_v0 }
  0x63   :  { %524 = vmatpush3.bf16.msra.mxu0 %v559_v35 }
 0x106   :  { %v176_v27 = vpop.f32.mrf.mxu0 }
 0x107   :  { %v177_v28 = vadd.f32 %v415_v26, %v176_v27 }
 0x108   :  { %v487_v29 = vpop.f32.mrf.mxu0 }
 0x109   :  { %v199_v30 = vmax.f32 %v177_v28, 0.0 }
 0x10a   :  { %v179_v31 = vpop.f32.mrf.mxu0 }
 0x10b   :  { %v200_v32 = vpack.c.bf16 %v199_v30, %v199_v30 }
 0x10c   :  { %v488_v33 = vpop.f32.mrf.mxu0 }
 0x10d   :  { %506 = vmatmul.mubr.bf16.vlgmr.msra.gmra.mxu1 %v200_v32 }
 0x1cd   :  { %v289_v37 = vpop.f32.mrf.mxu1 }
 0x1ce   :  { %v290_v38 = vadd.f32 %v424_v36, %v289_v37 }
 0x1cf   :  { %v507_v39 = vpop.f32.mrf.mxu1 }
 0x1d0   :  { %v312_v40 = vmax.f32 %v290_v38, 0.0 }
 0x1d1   :  { %v292_v41 = vpop.f32.mrf.mxu1 }
 0x1d2   :  { %v313_v42 = vpack.c.bf16 %v312_v40, %v312_v40 }
 0x1d3   :  { %v508_v43 = vpop.f32.mrf.mxu1 }
 0x1d4   :  { %526 = vmatmul.mubr.bf16.vlgmr.msra.gmra.mxu0 %v313_v42 }
 0x294   :  { %v402_v45 = vpop.f32.mrf.mxu0 }
 0x295   :  { %v403_v46 = vadd.f32 %v433_v44, %v402_v45 }
 0x296   :  { %v527_v47 = vpop.f32.mrf.mxu0 }
 0x297   :  { %408 = vst [vmem:[%s732_s7] sm:$0xff] %v403_v46 }
 0x298   :  { %v405_v48 = vpop.f32.mrf.mxu0 }
 0x29a   :  { %v528_v49 = vpop.f32.mrf.mxu0 }
 0x29b   :  { %413 = vsyncpa [#allocation3], 1 }
 0x29c   :  { %414 = vsyncpa [#allocation5], 1 }

</bundles_post_ra>
